<compile_context>
chip_gen: v6e
topology: v6e:2x2x1
jax: 0.10.0
libtpu: 0.0.40
codegen_flags: <defaults>
</compile_context>

<pallas_src>
import jax
import jax.numpy as jnp
from jax.experimental import pallas as pl
from jax.experimental.pallas import tpu as pltpu

EPS = 1e-6


def _gem_kernel(p_ref, x_ref, o_ref):
    # p_ref: (1,) f32 in SMEM;  x_ref: (1, HW, TC) VMEM;  o_ref: (1, 1, TC) VMEM
    p = p_ref[0]
    inv_p = 1.0 / p                                 # hoisted scalar reciprocal
    x = x_ref[...]
    xc = jnp.maximum(x, EPS)                        # clamp(min=eps)
    xp = jnp.exp(p * jnp.log(xc))                   # x**p with runtime exponent (x > 0)
    m = jnp.mean(xp, axis=1, keepdims=True)         # mean over H*W (second-minor axis)
    o_ref[...] = jnp.exp(jnp.log(m) * inv_p)        # (mean)**(1/p)


def gem_forward(x, p, *, tile_c=None):
    """x: (N, C, H, W) float32, p: (1,) float32 -> (N, C, 1, 1) float32."""
    N, C, H, W = x.shape
    HW = H * W

    # Channel-last layout: (N, HW, C) -> lane axis = C.
    x_t = jnp.transpose(x.reshape(N, C, HW), (0, 2, 1))

    # Lane-dense channel tile: multiple of 128 when possible, else full C.
    if tile_c is None:
        if C % 256 == 0:
            tile_c = 256
        elif C % 128 == 0:
            tile_c = 128
        else:
            tile_c = C
    grid = (N, C // tile_c)

    # Advisory cost hint for the XLA scheduler (transcendental-heavy kernel).
    cost = pl.CostEstimate(
        flops=3 * N * C * HW,
        transcendentals=2 * N * C * HW + 2 * N * C,
        bytes_accessed=4 * N * C * HW + 4 * N * C,
    )

    out = pl.pallas_call(
        _gem_kernel,
        out_shape=jax.ShapeDtypeStruct((N, 1, C), x.dtype),
        grid=grid,
        in_specs=[
            pl.BlockSpec(memory_space=pltpu.SMEM),                    # p (scalar param)
            pl.BlockSpec((1, HW, tile_c), lambda b, c: (b, 0, c)),    # input tile
        ],
        out_specs=pl.BlockSpec((1, 1, tile_c), lambda b, c: (b, 0, c)),
        compiler_params=pltpu.CompilerParams(
            dimension_semantics=("parallel", "parallel")),
        cost_estimate=cost,
    )(p, x_t)

    # (N, 1, C) -> (N, C, 1, 1)
    return jnp.transpose(out, (0, 2, 1)).reshape(N, C, 1, 1)


def gem_reference(x, p):
    """Pure-JAX reference mirroring the PyTorch GeM module."""
    xc = jnp.maximum(x, EPS)
    xp = xc ** p[0]
    m = jnp.mean(xp, axis=(-2, -1), keepdims=True)
    return m ** (1.0 / p[0])


if __name__ == "__main__":
    key = jax.random.PRNGKey(0)
    N, C, H, W = 2, 4, 16, 16
    x = jax.random.normal(key, (N, C, H, W), dtype=jnp.float32)

    # Deterministic parameter init, matching nn.Parameter(torch.ones(1) * 3)
    p = jnp.ones((1,), dtype=jnp.float32) * 3.0

    out = gem_forward(x, p)
    jax.block_until_ready(out)

    ref = gem_reference(x, p)
    assert out.shape == (N, C, 1, 1), out.shape
    assert jnp.allclose(out, ref, rtol=1e-4, atol=1e-5), (
        float(jnp.max(jnp.abs(out - ref)))
    )

    print("KERNEL_OK")
</pallas_src>

<mosaic_0001>
module attributes {stable_mosaic.version = 11 : i64} {
  func.func @_gem_kernel(%arg0: i32, %arg1: i32, %arg2: memref<1xf32, #tpu.memory_space<smem>>, %arg3: memref<1x256x4xf32, #tpu.memory_space<vmem>>, %arg4: memref<1x1x4xf32, #tpu.memory_space<vmem>>) attributes {dimension_semantics = [#tpu.dimension_semantics<parallel>, #tpu.dimension_semantics<parallel>], iteration_bounds = array<i64: 2, 1>, scalar_prefetch = 0 : i64, scratch_operands = 0 : i64, tpu.core_type = #tpu.core_type<tc>, window_params = [{transform_indices = @transform_0, window_bounds = array<i64: 1>}, {transform_indices = @transform_1, window_bounds = array<i64: 1, 256, 4>}, {transform_indices = @transform_2, window_bounds = array<i64: 1, 1, 4>}]} {
    %c0 = arith.constant 0 : index
    %0 = memref.load %arg2[%c0] : memref<1xf32, #tpu.memory_space<smem>>
    %cst = arith.constant 1.000000e+00 : f32
    %1 = arith.divf %cst, %0 : f32
    %c0_0 = arith.constant 0 : index
    %c0_1 = arith.constant 0 : index
    %c0_2 = arith.constant 0 : index
    %2 = vector.load %arg3[%c0_0, %c0_1, %c0_2] : memref<1x256x4xf32, #tpu.memory_space<vmem>>, vector<1x256x4xf32>
    %cst_3 = arith.constant 9.99999997E-7 : f32
    %3 = vector.broadcast %cst_3 : f32 to vector<1x256x4xf32>
    %4 = arith.maximumf %2, %3 : vector<1x256x4xf32>
    %5 = math.log %4 : vector<1x256x4xf32>
    %6 = vector.broadcast %0 : f32 to vector<1x256x4xf32>
    %7 = arith.mulf %6, %5 : vector<1x256x4xf32>
    %8 = math.exp %7 : vector<1x256x4xf32>
    %cst_4 = arith.constant dense<0.000000e+00> : vector<1x4xf32>
    %9 = vector.multi_reduction <add>, %8, %cst_4 [1] : vector<1x256x4xf32> to vector<1x4xf32>
    %10 = vector.shape_cast %9 : vector<1x4xf32> to vector<1x1x4xf32>
    %cst_5 = arith.constant 2.560000e+02 : f32
    %11 = vector.broadcast %cst_5 : f32 to vector<1x1x4xf32>
    %12 = arith.divf %10, %11 : vector<1x1x4xf32>
    %13 = math.log %12 : vector<1x1x4xf32>
    %14 = vector.broadcast %1 : f32 to vector<1x1x4xf32>
    %15 = arith.mulf %13, %14 : vector<1x1x4xf32>
    %16 = math.exp %15 : vector<1x1x4xf32>
    %c0_6 = arith.constant 0 : index
    %c0_7 = arith.constant 0 : index
    %c0_8 = arith.constant 0 : index
    %17 = vector.load %arg4[%c0_6, %c0_7, %c0_8] : memref<1x1x4xf32, #tpu.memory_space<vmem>>, vector<1x1x4xf32>
    tpu.vector_store %arg4[%c0_6, %c0_7, %c0_8], %16 {strides = array<i32>} : memref<1x1x4xf32, #tpu.memory_space<vmem>>, vector<1x1x4xf32>,
    return
  }
  func.func @transform_0(%arg0: i32, %arg1: i32) -> i32 {
    %c0_i32 = arith.constant 0 : i32
    %c0_i32_0 = arith.constant 0 : i32
    return %c0_i32 : i32
  }
  func.func @transform_1(%arg0: i32, %arg1: i32) -> (i32, i32, i32) {
    %c0_i32 = arith.constant 0 : i32
    %c0_i32_0 = arith.constant 0 : i32
    return %arg0, %c0_i32, %arg1 : i32, i32, i32
  }
  func.func @transform_2(%arg0: i32, %arg1: i32) -> (i32, i32, i32) {
    %c0_i32 = arith.constant 0 : i32
    %c0_i32_0 = arith.constant 0 : i32
    return %arg0, %c0_i32, %arg1 : i32, i32, i32
  }
}

</mosaic_0001>

<bundles_post_ra>
// kernel: tpu_custom_call.1
= control target key start
LH: loop header
LB: loop body
LE: loop exit
PB: predicated region body
PF: predicated region fallthrough
CT: control target
= control target key end

     0   :  { %s1065_s0 = inlined_call_operand.<no memory space> [shape: f32[1], index: 0, kind: input, shape index: {}]   ;;  %s1066_s1 = inlined_call_operand.vmem [shape: f32[2,256,4], index: 1, kind: input, shape index: {}]   ;;  %s1067_s2 = inlined_call_operand.hbm [shape: f32[2,1,4], index: 2, kind: output, shape index: {}]  }
   0x1   :  { %7 = sst [smem:[#allocation2]] %s1065_s0 }
   0x2   :  { %8 = vsyncpa [#allocation4], 0 }
   0x3   :  { %10 = vsyncpa [#allocation4 + $0x1], 0  ;;  %s859_s11 = smov 0   ;;  %s861_s12 = smov 0  }
   0x4   :  { %s863_s13 = smov 0   ;;  %s865_s14 = smov 0  }
   0x5   :  { %s867_s15 = smov 0   ;;  %s869_s16 = smov 0  }
   0x6 LB: > { %s560_s0 = sadd.s32 4294967295, %s838_s16   ;;  %s561_s17 = sadd.s32 4294967294, %s838_s16   ;;  %s838_s16 = sphi %s869_s16, %s16_s16   ;;  %s834_s15 = sphi %s867_s15, %s1074_s15   ;;  %s830_s14 = sphi %s865_s14, %s1073_s14   ;;  %s826_s13 = sphi %s863_s13, %s1072_s13   ;;  %s822_s12 = sphi %s861_s12, %s1071_s12   ;;  %s818_s11 = sphi %s859_s11, %s1070_s11  }
   0x7   : > { %s28_s18 = sadd.s32 1, %s834_s15  ;;  %s86_s19 = sadd.s32 1, %s826_s13 }
   0x8   : > { %p30_p0 = scmp.ge.s32.totalorder %s28_s18, 2  ;;  %p96_p1 = scmp.ne.s32.totalorder %s826_s13, %s822_s12 }
   0x9   : > { %p97_p2 = scmp.eq.s32.totalorder %s560_s0, 1  ;;  %p102_p3 = scmp.ne.s32.totalorder %s822_s12, %s818_s11 }
   0xa   : > { %s1076_s18 = smov (%p30_p0, %s28_s18), 0  ;;  %p103_p5 = scmp.eq.s32.totalorder %s561_s17, 1 }
   0xb   : > { %p899_p4 = por %p97_p2, %p96_p1  ;;  %s81_s21 = ssub.s32 %s834_s15, %s1076_s18 }
   0xc   : > { %p564_p6 = scmp.ge.s32.totalorder %s838_s16, 1  ;;  %p84_p7 = scmp.eq.s32.totalorder %s81_s21, 0 }
   0xd   : > { %p906_p8 = por %p103_p5, %p102_p3  ;;  %p135_p9 = scmp.lt.s32.totalorder %s838_s16, 3 }
   0xe   : > { %s912_s23 = scalar_select %p84_p7, %s826_s13, %s86_s19  }
   0xf   : > { %p136_p10 = pnand %p564_p6, %p135_p9 }
  0x10   : > { %p159_p11 = scmp.lt.s32.totalorder (!%p136_p10), %s830_s14, 1  ;;  %s167_s24 = sld [smem:[#allocation2]] (!%p136_p10) }
  0x11   : > { %139 = sbr.rel (%p136_p10) target bundleno = 188 (0xbc), region = 28  ;;  %s157_s3 = sand.u32 (!%p136_p10), 1, %s822_s12  }
  0x12   : > { %s567_s4 = sshll.u32 (!%p136_p10), %s830_s14, 4  ;;  %s158_s5 = scalar_lea.vmem (!%p136_p10), [#allocation3], %s157_s3 }
  0x13   : > { %s490_s6 = sshll.u32 (!%p136_p10), %s158_s5, 4  ;;  %s1025_s9 = scalar_lea.hbm (!%p136_p10), %s1067_s2, %s567_s4  ;;  %s491_s6 = int_to_ptr.vmem [resolvable:$true] %s490_s6 }
  0x14   : > { %s477_s10 = scalar_lea.sflag (!%p136_p10), [#allocation4], %s157_s3  ;;  %s762_s0 = scalar_lea.vmem (!%p136_p10), %s491_s6, 16 }
  0x15   : > { %p763_p12 = scmp.ne.s32.totalorder (!%p136_p10), %s491_s6, %s762_s0  ;;  %s840_s17 = smov (!%p136_p10), [#allocation3]  }
  0x16   : > { %s160_s25 = scalar_select %p159_p11, %s830_s14, 1  ;;  %v922_v1 = vstv %s167_s24  ;;  %vm396_vm0 = vcmask 31744   ;;  %vm474_vm1 = vcmask 24576  }
  0x17   : > { %628 = vrcp.f32 %v922_v1  ;;  %p764_p13 = pnand %p763_p12, %p899_p4  ;;  %s766_s19 = sshll.u32 %s840_s17, 4  ;;  %s767_s19 = int_to_ptr.vmem [resolvable:$false] %s766_s19 }
  0x18   : > { %s570_s26 = sshll.u32 %s160_s25, 8  ;;  %s768_s14 = scalar_lea.vmem %s767_s19, 32 }
  0x19   : > { %s919_s29 = scalar_lea.vmem %s1066_s1, %s570_s26  ;;  %p765_p0 = pneg %p764_p13 }
  0x1a   : > { %v171_v0 = vld [vmem:[%s919_s29] sm:$0xff]  ;;  %v172_v2 = vld [vmem:[%s919_s29 + $0x8] sm:$0xff]  ;;  %v173_v3 = vld [vmem:[%s919_s29 + $0x10] sm:$0xff]  ;;  %p769_p1 = scmp.lt.s32.totalorder %s491_s6, %s767_s19  ;;  %p770_p2 = scmp.lt.s32.totalorder %s768_s14, %s762_s0 }
  0x1b   : > { %v174_v4 = vld [vmem:[%s919_s29 + $0x18] sm:$0xff]  ;;  %v203_v5 = vmax.f32 %v171_v0, 1e-06  ;;  %v175_v6 = vld [vmem:[%s919_s29 + $0x20] sm:$0xff]  ;;  %v204_v7 = vmax.f32 %v172_v2, 1e-06 }
  0x1c   : > { %v205_v8 = vmax.f32 %v173_v3, 1e-06  ;;  %v176_v9 = vld [vmem:[%s919_s29 + $0x28] sm:$0xff]  ;;  %v206_v10 = vmax.f32 %v174_v4, 1e-06  ;;  %v177_v12 = vld [vmem:[%s919_s29 + $0x30] sm:$0xff]  ;;  %p771_p3 = por %p770_p2, %p769_p1 }
  0x1d   : > { %v207_v11 = vmax.f32 %v175_v6, 1e-06  ;;  %630 = vlog2.f32 %v203_v5  ;;  %v208_v13 = vmax.f32 %v176_v9, 1e-06  ;;  %v178_v14 = vld [vmem:[%s919_s29 + $0x38] sm:$0xff]  ;;  %v179_v16 = vld [vmem:[%s919_s29 + $0x40] sm:$0xff] }
  0x1e   : > { %632 = vlog2.f32 %v204_v7  ;;  %v209_v15 = vmax.f32 %v177_v12, 1e-06  ;;  %v210_v17 = vmax.f32 %v178_v14, 1e-06  ;;  %v180_v18 = vld [vmem:[%s919_s29 + $0x48] sm:$0xff]  ;;  %v181_v21 = vld [vmem:[%s919_s29 + $0x50] sm:$0xff]  ;;  %p772_p5 = pnand %p771_p3, %p765_p0 }
  0x1f   : > { %634 = vlog2.f32 %v205_v8  ;;  %v211_v20 = vmax.f32 %v179_v16, 1e-06  ;;  %v212_v22 = vmax.f32 %v180_v18, 1e-06  ;;  %v182_v23 = vld [vmem:[%s919_s29 + $0x58] sm:$0xff]  ;;  %v183_v26 = vld [vmem:[%s919_s29 + $0x60] sm:$0xff] }
  0x20   : > { %636 = vlog2.f32 %v206_v10  ;;  %v213_v24 = vmax.f32 %v181_v21, 1e-06  ;;  %v214_v28 = vmax.f32 %v182_v23, 1e-06  ;;  %v184_v30 = vld [vmem:[%s919_s29 + $0x68] sm:$0xff]  ;;  %v185_v32 = vld [vmem:[%s919_s29 + $0x70] sm:$0xff] }
  0x21   : > { %638 = vlog2.f32 %v207_v11  ;;  %v215_v33 = vmax.f32 %v183_v26, 1e-06  ;;  %v186_v36 = vld [vmem:[%s919_s29 + $0x78] sm:$0xff]  ;;  %v187_v38 = vld [vmem:[%s919_s29 + $0x80] sm:$0xff]  ;;  %v216_v39 = vmax.f32 %v184_v30, 1e-06 }
  0x22   : > { %640 = vlog2.f32 %v208_v13  ;;  %v188_v42 = vld [vmem:[%s919_s29 + $0x88] sm:$0xff]  ;;  %v217_v43 = vmax.f32 %v185_v32, 1e-06  ;;  %v189_v45 = vld [vmem:[%s919_s29 + $0x90] sm:$0xff]  ;;  %v218_v46 = vmax.f32 %v186_v36, 1e-06 }
  0x23   : > { %642 = vlog2.f32 %v209_v15  ;;  %v219_v50 = vmax.f32 %v187_v38, 1e-06  ;;  %v220_v52 = vmax.f32 %v188_v42, 1e-06  ;;  %v221_v56 = vmax.f32 %v189_v45, 1e-06 }
  0x24   : > { %v629_v19 = vpop.eup %628  ;;  %644 = vlog2.f32 %v210_v17  ;;  %v190_v63 = vld [vmem:[%s919_s29 + $0x98] sm:$0xff]  ;;  %v191_v6 = vld [vmem:[%s919_s29 + $0xa0] sm:$0xff]  ;;  %v192_v12 = vld [vmem:[%s919_s29 + $0xa8] sm:$0xff] }
  0x25   : > { %571 = vpush %v629_v19  ;;  %646 = vlog2.f32 %v211_v20  ;;  %v222_v11 = vmax.f32 %v190_v63, 1e-06  ;;  %v223_v17 = vmax.f32 %v191_v6, 1e-06  ;;  %v193_v18 = vld [vmem:[%s919_s29 + $0xb0] sm:$0xff]  ;;  %v196_v38 = vld [vmem:[%s919_s29 + $0xc8] sm:$0xff] }
  0x26   : > { %648 = vlog2.f32 %v212_v22  ;;  %v224_v23 = vmax.f32 %v192_v12, 1e-06 }
  0x27   : > { %650 = vlog2.f32 %v213_v24  ;;  %v194_v24 = vld [vmem:[%s919_s29 + $0xb8] sm:$0xff] }
  0x28   : > { %652 = vlog2.f32 %v214_v28  ;;  %v226_v36 = vmax.f32 %v194_v24, 1e-06 }
  0x29   : > { %654 = vlog2.f32 %v215_v33 }
  0x2a   : > { %v631_v25 = vpop.eup %630  ;;  %656 = vlog2.f32 %v216_v39  ;;  %v197_v39 = vld [vmem:[%s919_s29 + $0xd0] sm:$0xff] }
  0x2b   : > { %v633_v27 = vpop.eup %632  ;;  %v236_v34 = vmul.f32 0.6931472, %v631_v25  ;;  %658 = vlog2.f32 %v217_v43 }
  0x2c   : > { %v635_v29 = vpop.eup %634  ;;  %v238_v37 = vmul.f32 0.6931472, %v633_v27  ;;  %660 = vlog2.f32 %v218_v46 }
  0x2d   : > { %v637_v31 = vpop.eup %636  ;;  %v240_v40 = vmul.f32 0.6931472, %v635_v29  ;;  %v300_v48 = vmul.f32 %v236_v34, %v922_v1  ;;  %662 = vlog2.f32 %v219_v50  ;;  %v225_v29 = vmax.f32 %v193_v18, 1e-06 }
  0x2e   : > { %v639_v35 = vpop.eup %638  ;;  %v242_v44 = vmul.f32 0.6931472, %v637_v31  ;;  %v301_v51 = vmul.f32 %v238_v37, %v922_v1  ;;  %664 = vlog2.f32 %v220_v52  ;;  %v195_v31 = vld [vmem:[%s919_s29 + $0xc0] sm:$0xff]  ;;  %v228_v50 = vmax.f32 %v196_v38, 1e-06 }
  0x2f   : > { %v641_v41 = vpop.eup %640  ;;  %v244_v47 = vmul.f32 0.6931472, %v639_v35  ;;  %v302_v54 = vmul.f32 %v240_v40, %v922_v1  ;;  %v332_v60 = vmul.f32 1.442695, %v300_v48  ;;  %666 = vlog2.f32 %v221_v56 }
  0x30   : > { %v643_v49 = vpop.eup %642  ;;  %v246_v53 = vmul.f32 0.6931472, %v641_v41  ;;  %v303_v57 = vmul.f32 %v242_v44, %v922_v1  ;;  %v334_v62 = vmul.f32 1.442695, %v301_v51  ;;  %v227_v44 = vmax.f32 %v195_v31, 1e-06 }
  0x31   : > { %v645_v55 = vpop.eup %644  ;;  %v248_v58 = vmul.f32 0.6931472, %v643_v49  ;;  %v304_v59 = vmul.f32 %v244_v47, %v922_v1  ;;  %v336_v3 = vmul.f32 1.442695, %v302_v54  ;;  %668 = vpow2.f32 %v332_v60 }
  0x32   : > { %v647_v61 = vpop.eup %646  ;;  %v250_v0 = vmul.f32 0.6931472, %v645_v55  ;;  %v305_v2 = vmul.f32 %v246_v53, %v922_v1  ;;  %v338_v5 = vmul.f32 1.442695, %v303_v57  ;;  %670 = vpow2.f32 %v334_v62  ;;  %v198_v53 = vld [vmem:[%s919_s29 + $0xd8] sm:$0xff]  ;;  %v199_v62 = vld [vmem:[%s919_s29 + $0xe0] sm:$0xff] }
  0x33   : > { %v649_v4 = vpop.eup %648  ;;  %v252_v7 = vmul.f32 0.6931472, %v647_v61  ;;  %v306_v8 = vmul.f32 %v248_v58, %v922_v1  ;;  %v340_v9 = vmul.f32 1.442695, %v304_v59  ;;  %672 = vpow2.f32 %v336_v3 }
  0x34   : > { %v651_v10 = vpop.eup %650  ;;  %v254_v13 = vmul.f32 0.6931472, %v649_v4  ;;  %v307_v14 = vmul.f32 %v250_v0, %v922_v1  ;;  %v342_v15 = vmul.f32 1.442695, %v305_v2  ;;  %674 = vpow2.f32 %v338_v5 }
  0x35   : > { %v653_v16 = vpop.eup %652  ;;  %v256_v19 = vmul.f32 0.6931472, %v651_v10  ;;  %v308_v20 = vmul.f32 %v252_v7, %v922_v1  ;;  %676 = vpow2.f32 %v340_v9  ;;  %v344_v21 = vmul.f32 1.442695, %v306_v8  ;;  %v200_v8 = vld [vmem:[%s919_s29 + $0xe8] sm:$0xff] }
  0x36   : > { %v655_v22 = vpop.eup %654  ;;  %678 = vlog2.f32 %v222_v11  ;;  %v258_v25 = vmul.f32 0.6931472, %v653_v16  ;;  %v309_v26 = vmul.f32 %v254_v13, %v922_v1  ;;  %v346_v27 = vmul.f32 1.442695, %v307_v14 }
  0x37   : > { %680 = vpow2.f32 %v342_v15  ;;  %v657_v28 = vpop.eup %656  ;;  %v260_v32 = vmul.f32 0.6931472, %v655_v22  ;;  %v310_v33 = vmul.f32 %v256_v19, %v922_v1  ;;  %v348_v34 = vmul.f32 1.442695, %v308_v20 }
  0x38   : > { %682 = vlog2.f32 %v223_v17  ;;  %v659_v30 = vpop.eup %658  ;;  %v262_v40 = vmul.f32 0.6931472, %v657_v28  ;;  %v311_v41 = vmul.f32 %v258_v25, %v922_v1  ;;  %v350_v42 = vmul.f32 1.442695, %v309_v26  ;;  %v201_v17 = vld [vmem:[%s919_s29 + $0xf0] sm:$0xff]  ;;  %v202_v26 = vld [vmem:[%s919_s29 + $0xf8] sm:$0xff] }
  0x39   : > { %684 = vpow2.f32 %v344_v21  ;;  %v661_v35 = vpop.eup %660  ;;  %v264_v45 = vmul.f32 0.6931472, %v659_v30  ;;  %v312_v47 = vmul.f32 %v260_v32, %v922_v1  ;;  %v352_v48 = vmul.f32 1.442695, %v310_v33 }
  0x3a   : > { %686 = vlog2.f32 %v224_v23  ;;  %v663_v37 = vpop.eup %662  ;;  %v229_v51 = vmax.f32 %v197_v39, 1e-06  ;;  %v266_v54 = vmul.f32 0.6931472, %v661_v35  ;;  %v313_v55 = vmul.f32 %v262_v40, %v922_v1 }
  0x3b   : > { %688 = vpow2.f32 %v346_v27  ;;  %v665_v43 = vpop.eup %664  ;;  %v354_v56 = vmul.f32 1.442695, %v311_v41  ;;  %v268_v58 = vmul.f32 0.6931472, %v663_v37  ;;  %v314_v59 = vmul.f32 %v264_v45, %v922_v1 }
  0x3c   : > { %690 = vlog2.f32 %v225_v29  ;;  %v667_v46 = vpop.eup %666  ;;  %v356_v63 = vmul.f32 1.442695, %v312_v47  ;;  %v230_v4 = vmax.f32 %v198_v53, 1e-06  ;;  %v270_v5 = vmul.f32 0.6931472, %v665_v43 }
  0x3d   : > { %692 = vpow2.f32 %v348_v34  ;;  %v315_v9 = vmul.f32 %v266_v54, %v922_v1  ;;  %v358_v10 = vmul.f32 1.442695, %v313_v55  ;;  %v231_v13 = vmax.f32 %v199_v62, 1e-06 }
  0x3e   : > { %v669_v49 = vpop.eup %668  ;;  %694 = vlog2.f32 %v226_v36  ;;  %v272_v14 = vmul.f32 0.6931472, %v667_v46  ;;  %v316_v18 = vmul.f32 %v268_v58, %v922_v1  ;;  %v360_v19 = vmul.f32 1.442695, %v314_v59 }
  0x3f   : > { %v671_v52 = vpop.eup %670  ;;  %696 = vpow2.f32 %v350_v42  ;;  %v397_v60 = vsel %vm396_vm0, %v669_v49, 0.0  ;;  %v232_v22 = vmax.f32 %v200_v8, 1e-06  ;;  %v317_v27 = vmul.f32 %v270_v5, %v922_v1 }
  0x40   : > { %v673_v57 = vpop.eup %672  ;;  %698 = vlog2.f32 %v227_v44  ;;  %v398_v0 = vsel %vm396_vm0, %v671_v52, 0.0  ;;  %v362_v28 = vmul.f32 1.442695, %v315_v9  ;;  %v233_v31 = vmax.f32 %v201_v17, 1e-06 }
  0x41   : > { %v675_v61 = vpop.eup %674  ;;  %700 = vpow2.f32 %v352_v48  ;;  %v400_v2 = vsel %vm396_vm0, %v673_v57, 0.0  ;;  %v399_v6 = vadd.f32 %v398_v0, %v397_v60  ;;  %v318_v35 = vmul.f32 %v272_v14, %v922_v1 }
  0x42   : > { %v677_v3 = vpop.eup %676  ;;  %702 = vlog2.f32 %v228_v50  ;;  %v402_v11 = vsel %vm396_vm0, %v675_v61, 0.0  ;;  %v364_v36 = vmul.f32 1.442695, %v316_v18  ;;  %v234_v39 = vmax.f32 %v202_v26, 1e-06 }
  0x43   : > { %v679_v7 = vpop.eup %678  ;;  %704 = vpow2.f32 %v354_v56  ;;  %v401_v15 = vadd.f32 %v400_v2, %v399_v6  ;;  %v404_v20 = vsel %vm396_vm0, %v677_v3, 0.0  ;;  %v366_v44 = vmul.f32 1.442695, %v317_v27 }
  0x44   : > { %v681_v12 = vpop.eup %680  ;;  %706 = vlog2.f32 %v229_v51  ;;  %v274_v23 = vmul.f32 0.6931472, %v679_v7  ;;  %v368_v51 = vmul.f32 1.442695, %v318_v35 }
  0x45   : > { %v683_v16 = vpop.eup %682  ;;  %708 = vpow2.f32 %v356_v63  ;;  %v403_v24 = vadd.f32 %v402_v11, %v401_v15  ;;  %v406_v29 = vsel %vm396_vm0, %v681_v12, 0.0 }
  0x46   : > { %v685_v21 = vpop.eup %684  ;;  %710 = vlog2.f32 %v230_v4  ;;  %v276_v32 = vmul.f32 0.6931472, %v683_v16  ;;  %v319_v43 = vmul.f32 %v274_v23, %v922_v1 }
  0x47   : > { %v687_v25 = vpop.eup %686  ;;  %712 = vpow2.f32 %v358_v10  ;;  %v405_v33 = vadd.f32 %v404_v20, %v403_v24  ;;  %v408_v37 = vsel %vm396_vm0, %v685_v21, 0.0 }
  0x48   : > { %v689_v30 = vpop.eup %688  ;;  %714 = vlog2.f32 %v231_v13  ;;  %v278_v40 = vmul.f32 0.6931472, %v687_v25  ;;  %v320_v50 = vmul.f32 %v276_v32, %v922_v1  ;;  %v370_v58 = vmul.f32 1.442695, %v319_v43 }
  0x49   : > { %v691_v34 = vpop.eup %690  ;;  %716 = vpow2.f32 %v360_v19  ;;  %v407_v41 = vadd.f32 %v406_v29, %v405_v33  ;;  %v410_v45 = vsel %vm396_vm0, %v689_v30, 0.0 }
  0x4a   : > { %v693_v38 = vpop.eup %692  ;;  %718 = vlog2.f32 %v232_v22  ;;  %v280_v47 = vmul.f32 0.6931472, %v691_v34  ;;  %v321_v57 = vmul.f32 %v278_v40, %v922_v1  ;;  %v372_v2 = vmul.f32 1.442695, %v320_v50 }
  0x4b   : > { %v695_v42 = vpop.eup %694  ;;  %720 = vpow2.f32 %v362_v28  ;;  %v409_v48 = vadd.f32 %v408_v37, %v407_v41  ;;  %v412_v52 = vsel %vm396_vm0, %v693_v38, 0.0 }
  0x4c   : > { %v697_v46 = vpop.eup %696  ;;  %722 = vlog2.f32 %v233_v31  ;;  %v282_v54 = vmul.f32 0.6931472, %v695_v42  ;;  %v322_v0 = vmul.f32 %v280_v47, %v922_v1  ;;  %v374_v9 = vmul.f32 1.442695, %v321_v57 }
  0x4d   : > { %v699_v49 = vpop.eup %698  ;;  %724 = vpow2.f32 %v364_v36  ;;  %v411_v55 = vadd.f32 %v410_v45, %v409_v48  ;;  %v414_v59 = vsel %vm396_vm0, %v697_v46, 0.0 }
  0x4e   : > { %v701_v53 = vpop.eup %700  ;;  %726 = vlog2.f32 %v234_v39  ;;  %v284_v61 = vmul.f32 0.6931472, %v699_v49  ;;  %v323_v8 = vmul.f32 %v282_v54, %v922_v1  ;;  %v376_v16 = vmul.f32 1.442695, %v322_v0 }
  0x4f   : > { %v703_v56 = vpop.eup %702  ;;  %728 = vpow2.f32 %v366_v44  ;;  %v413_v62 = vadd.f32 %v412_v52, %v411_v55  ;;  %v416_v3 = vsel %vm396_vm0, %v701_v53, 0.0 }
  0x50   : > { %v705_v60 = vpop.eup %704  ;;  %730 = vpow2.f32 %v368_v51  ;;  %v286_v5 = vmul.f32 0.6931472, %v703_v56  ;;  %v324_v15 = vmul.f32 %v284_v61, %v922_v1  ;;  %v378_v23 = vmul.f32 1.442695, %v323_v8 }
  0x51   : > { %v707_v63 = vpop.eup %706  ;;  %v415_v6 = vadd.f32 %v414_v59, %v413_v62  ;;  %732 = vpow2.f32 %v370_v58  ;;  %v418_v10 = vsel %vm396_vm0, %v705_v60, 0.0 }
  0x52   : > { %v709_v4 = vpop.eup %708  ;;  %v288_v12 = vmul.f32 0.6931472, %v707_v63  ;;  %734 = vpow2.f32 %v372_v2  ;;  %v325_v22 = vmul.f32 %v286_v5, %v922_v1  ;;  %v380_v30 = vmul.f32 1.442695, %v324_v15 }
  0x53   : > { %v711_v7 = vpop.eup %710  ;;  %v417_v13 = vadd.f32 %v416_v3, %v415_v6  ;;  %v420_v17 = vsel %vm396_vm0, %v709_v4, 0.0  ;;  %736 = vpow2.f32 %v374_v9 }
  0x54   : > { %v713_v11 = vpop.eup %712  ;;  %v290_v19 = vmul.f32 0.6931472, %v711_v7  ;;  %v326_v29 = vmul.f32 %v288_v12, %v922_v1  ;;  %738 = vpow2.f32 %v376_v16  ;;  %v382_v37 = vmul.f32 1.442695, %v325_v22 }
  0x55   : > { %v715_v14 = vpop.eup %714  ;;  %v419_v20 = vadd.f32 %v418_v10, %v417_v13  ;;  %v422_v24 = vsel %vm396_vm0, %v713_v11, 0.0  ;;  %740 = vpow2.f32 %v378_v23 }
  0x56   : > { %v717_v18 = vpop.eup %716  ;;  %v292_v26 = vmul.f32 0.6931472, %v715_v14  ;;  %v327_v36 = vmul.f32 %v290_v19, %v922_v1  ;;  %742 = vpow2.f32 %v380_v30  ;;  %v384_v43 = vmul.f32 1.442695, %v326_v29  ;;  %s572_s30 = spop %571 }
  0x57   : > { %v719_v21 = vpop.eup %718  ;;  %v421_v27 = vadd.f32 %v420_v17, %v419_v20  ;;  %v424_v31 = vsel %vm396_vm0, %v717_v18, 0.0  ;;  %744 = vpow2.f32 %v382_v37 }
  0x58   : > { %v721_v25 = vpop.eup %720  ;;  %v294_v33 = vmul.f32 0.6931472, %v719_v21  ;;  %v328_v42 = vmul.f32 %v292_v26, %v922_v1  ;;  %v386_v49 = vmul.f32 1.442695, %v327_v36  ;;  %746 = vpow2.f32 %v384_v43 }
  0x59   : > { %v723_v28 = vpop.eup %722  ;;  %v423_v34 = vadd.f32 %v422_v24, %v421_v27  ;;  %v426_v38 = vsel %vm396_vm0, %v721_v25, 0.0 }
  0x5a   : > { %v725_v32 = vpop.eup %724  ;;  %v296_v40 = vmul.f32 0.6931472, %v723_v28  ;;  %v329_v48 = vmul.f32 %v294_v33, %v922_v1  ;;  %v388_v54 = vmul.f32 1.442695, %v328_v42  ;;  %748 = vpow2.f32 %v386_v49 }
  0x5b   : > { %v727_v35 = vpop.eup %726  ;;  %v425_v41 = vadd.f32 %v424_v31, %v423_v34  ;;  %v428_v44 = vsel %vm396_vm0, %v725_v32, 0.0 }
  0x5c   : > { %v729_v39 = vpop.eup %728  ;;  %v298_v46 = vmul.f32 0.6931472, %v727_v35  ;;  %v330_v53 = vmul.f32 %v296_v40, %v922_v1  ;;  %v390_v59 = vmul.f32 1.442695, %v329_v48  ;;  %750 = vpow2.f32 %v388_v54 }
  0x5d   : > { %v731_v45 = vpop.eup %730  ;;  %v427_v47 = vadd.f32 %v426_v38, %v425_v41  ;;  %v430_v50 = vsel %vm396_vm0, %v729_v39, 0.0 }
  0x5e   : > { %v733_v51 = vpop.eup %732  ;;  %v432_v55 = vsel %vm396_vm0, %v731_v45, 0.0  ;;  %v331_v58 = vmul.f32 %v298_v46, %v922_v1  ;;  %v392_v63 = vmul.f32 1.442695, %v330_v53  ;;  %752 = vpow2.f32 %v390_v59 }
  0x5f   : > { %v429_v52 = vadd.f32 %v428_v44, %v427_v47  ;;  %v735_v56 = vpop.eup %734  ;;  %v434_v60 = vsel %vm396_vm0, %v733_v51, 0.0  ;;  %v470_v44 = vstv %s572_s30 }
  0x60   : > { %v737_v61 = vpop.eup %736  ;;  %v436_v0 = vsel %vm396_vm0, %v735_v56, 0.0  ;;  %v394_v4 = vmul.f32 1.442695, %v331_v58  ;;  %754 = vpow2.f32 %v392_v63 }
  0x61   : > { %v431_v57 = vadd.f32 %v430_v50, %v429_v52  ;;  %v739_v2 = vpop.eup %738  ;;  %v438_v5 = vsel %vm396_vm0, %v737_v61, 0.0 }
  0x62   : > { %v741_v6 = vpop.eup %740  ;;  %v440_v1 = vsel %vm396_vm0, %v739_v2, 0.0  ;;  %756 = vpow2.f32 %v394_v4 }
  0x63   : > { %v433_v62 = vadd.f32 %v432_v55, %v431_v57  ;;  %v743_v8 = vpop.eup %742  ;;  %v442_v10 = vsel %vm396_vm0, %v741_v6, 0.0 }
  0x64   : > { %v745_v11 = vpop.eup %744  ;;  %v444_v13 = vsel %vm396_vm0, %v743_v8, 0.0 }
  0x65   : > { %v435_v3 = vadd.f32 %v434_v60, %v433_v62  ;;  %v747_v14 = vpop.eup %746  ;;  %v446_v16 = vsel %vm396_vm0, %v745_v11, 0.0 }
  0x66   : > { %v448_v19 = vsel %vm396_vm0, %v747_v14, 0.0 }
  0x67   : > { %v437_v7 = vadd.f32 %v436_v0, %v435_v3  ;;  %v749_v17 = vpop.eup %748 }
  0x68   : > { %v450_v22 = vsel %vm396_vm0, %v749_v17, 0.0 }
  0x69   : > { %v439_v9 = vadd.f32 %v438_v5, %v437_v7  ;;  %v751_v20 = vpop.eup %750 }
  0x6a   : > { %v452_v25 = vsel %vm396_vm0, %v751_v20, 0.0 }
  0x6b   : > { %v441_v12 = vadd.f32 %v440_v1, %v439_v9  ;;  %v753_v23 = vpop.eup %752 }
  0x6c   : > { %v454_v28 = vsel %vm396_vm0, %v753_v23, 0.0 }
  0x6d   : > { %v443_v15 = vadd.f32 %v442_v10, %v441_v12  ;;  %v755_v26 = vpop.eup %754 }
  0x6e   : > { %v456_v31 = vsel %vm396_vm0, %v755_v26, 0.0 }
  0x6f   : > { %v445_v18 = vadd.f32 %v444_v13, %v443_v15  ;;  %v757_v29 = vpop.eup %756 }
  0x70   : > { %v458_v33 = vsel %vm396_vm0, %v757_v29, 0.0 }
  0x71   : > { %v447_v21 = vadd.f32 %v446_v16, %v445_v18 }
  0x73   : > { %v449_v24 = vadd.f32 %v448_v19, %v447_v21 }
  0x75   : > { %v451_v27 = vadd.f32 %v450_v22, %v449_v24 }
  0x77   : > { %v453_v30 = vadd.f32 %v452_v25, %v451_v27 }
  0x79   : > { %v455_v32 = vadd.f32 %v454_v28, %v453_v30 }
  0x7b   : > { %v457_v34 = vadd.f32 %v456_v31, %v455_v32 }
  0x7d   : > { %v459_v35 = vadd.f32 %v458_v33, %v457_v34 }
  0x7f   : > { %v460_v36 = vrot.slane %v459_v35, 4 }
  0x81   : > { %v461_v37 = vadd.f32 %v460_v36, %v459_v35 }
  0x83   : > { %v462_v38 = vrot.slane %v461_v37, 2 }
  0x85   : > { %v463_v39 = vadd.f32 %v462_v38, %v461_v37 }
  0x87   : > { %v464_v40 = vrot.slane %v463_v39, 1 }
  0x89   : > { %v465_v41 = vadd.f32 %v464_v40, %v463_v39 }
  0x8b   : > { %v467_v42 = vmul.f32 0.00390625, %v465_v41 }
  0x8d   : > { %758 = vlog2.f32 %v467_v42 }
  0x9a   : > { %v759_v43 = vpop.eup %758 }
  0x9b   : > { %v469_v45 = vmul.f32 0.6931472, %v759_v43 }
  0x9d   : > { %v471_v46 = vmul.f32 %v470_v44, %v469_v45 }
  0x9f   : > { %v472_v47 = vmul.f32 1.442695, %v471_v46 }
  0xa1   : > { %760 = vpow2.f32 %v472_v47 }
  0xae   : > { %v761_v48 = vpop.eup %760 }
  0xaf   : > { %475 = vst.msk [vmem:[%s158_s5] sm:$0x1] %vm474_vm1, %v761_v48 }
  0xb0   : > { %775 = shalt.err (!%p772_p5)
}
  0xb1   : > { %s776_s21 = scalar_lea.hbm %s1025_s9, 16  ;;  %s780_s26 = scalar_lea.hbm %s1067_s2, 32 }
  0xb2   : > { %p777_p6 = scmp.ne.s32.totalorder %s1025_s9, %s776_s21  ;;  %p781_p10 = scmp.lt.s32.totalorder %s1025_s9, %s1067_s2 }
  0xb3   : > { %p782_p11 = scmp.lt.s32.totalorder %s780_s26, %s776_s21 }
  0xb4   : > { %p778_p7 = pnand %p777_p6, %p899_p4 }
  0xb5   : > { %p783_p12 = por %p782_p11, %p781_p10 }
  0xb6   : > { %p779_p9 = pneg %p778_p7 }
  0xb8   : > { %p784_p13 = pnand %p783_p12, %p779_p9 }
  0xba   : > { %787 = shalt.err (!%p784_p13)
}
  0xbb   : > { %573 = dma.vmem_to_hbm [thread:$0]  (%p899_p4), %s491_s6, 16, %s1025_s9, %s477_s10  }
  0xbc PF: > { %p579_p0 = scmp.ge.s32.totalorder %s838_s16, 2  ;;  %s502_s29 = sand.u32 1, %s818_s11  }
  0xbd   : > { %s503_s30 = scalar_lea.sflag [#allocation4], %s502_s29 }
  0xbe   : > { %p576_p1 = pnand %p579_p0, %p906_p8 }
  0xc0   : > { %p577_p2 = pneg %p576_p1 }
  0xc2   : > { %813 = dma.done.wait (%p577_p2), %s503_s30, 16  }
  0xc3   : > { %815 = vsyncadd (%p577_p2), %s503_s30, 4294967280  ;;  %s16_s16 = sadd.s32 1, %s838_s16   ;;  %s1070_s11 = smov %s822_s12 }
  0xc4   : > { %p13_p3 = scmp.ge.s32.totalorder %s16_s16, 4   ;;  %s1071_s12 = smov %s826_s13 }
  0xc5   : > { %s1072_s13 = smov %s912_s23  ;;  %s1073_s14 = smov %s834_s15 }
  0xc6   : > { %s1074_s15 = smov %s1076_s18  ;;  %15 = sbr.rel (!%p13_p3) target bundleno = 6 (0x6), region = 63 }
  0xcb   :  { %507 = vsyncpa [#allocation4], 1 }
  0xcc   :  { %509 = vsyncpa [#allocation4 + $0x1], 1 }

</bundles_post_ra>
